<compile_context>
chip_gen: v6e
topology: v6e:2x2x1
jax: 0.10.0
libtpu: 0.0.40
codegen_flags: <defaults>
</compile_context>

<pallas_src>
import functools

import jax
import jax.numpy as jnp
from jax.experimental import pallas as pl
from jax.experimental.pallas import tpu as pltpu


def _round_up(x, m):
    return ((x + m - 1) // m) * m


_NEG_BIG = -1e30  # "minus infinity" for softmax masking of padded lanes


def _cfmam_kernel(layer_meta, e_pad, n_out, classification,
                  x1_ref, x2_ref, w_ref, b_ref, out_ref):
    """Fused MLP over one batch tile.

    layer_meta: static tuple of (row_offset, in_pad, out_pad, relu) per layer,
                indexing into the packed (sublane/lane aligned) weight buffer.
    e_pad:      padded feature width of x1 (== x2); layer 0 consumes both halves.
    n_out:      true (unpadded) output width of the final layer.
    """
    # --- layer 0: concat folded into a split matmul (both slices aligned) ---
    row0, _, out0, relu0 = layer_meta[0]
    w_top = w_ref[row0:row0 + e_pad, :out0]
    w_bot = w_ref[row0 + e_pad:row0 + 2 * e_pad, :out0]
    h = (jnp.dot(x1_ref[...], w_top, preferred_element_type=jnp.float32)
         + jnp.dot(x2_ref[...], w_bot, preferred_element_type=jnp.float32)
         + b_ref[0:1, :out0])
    if relu0:
        h = jnp.maximum(h, 0.0)

    # --- remaining layers (full 128-lane padded width, unmasked ops) --------
    for li, (row, in_d, out_d, relu) in enumerate(layer_meta[1:], start=1):
        w = w_ref[row:row + in_d, :out_d]
        h = (jnp.dot(h.astype(w_ref.dtype), w, preferred_element_type=jnp.float32)
             + b_ref[li:li + 1, :out_d])
        if relu:
            h = jnp.maximum(h, 0.0)

    # --- head activation (padded lanes excluded from the softmax) -----------
    width = h.shape[-1]
    lane = jax.lax.broadcasted_iota(jnp.int32, (1, width), 1)
    valid = lane < n_out
    if classification:
        # TODO(synk): activation_func('d') is undefined in the original snippet;
        # assumed to be a row-wise softmax (typical classification head).
        logits = jnp.where(valid, h, _NEG_BIG)
        z_max = jnp.max(logits, axis=-1, keepdims=True)
        e = jnp.exp(logits - z_max)                    # padded lanes -> 0
        out = e / jnp.sum(e, axis=-1, keepdims=True)   # exact normalization
    else:
        out = jnp.where(valid, jax.nn.sigmoid(h), 0.0)

    out_ref[...] = out.astype(out_ref.dtype)


def init_cfmam_params(key, embedding_dim, n_y, n_layer, classification=True):
    """Deterministic init mimicking torch.nn.Linear defaults
    (uniform(-1/sqrt(fan_in), 1/sqrt(fan_in))). Weights stored as (in, out)."""
    input_size = embedding_dim * 2
    dims = [input_size, input_size]          # mem_layer
    last = input_size
    for _ in range(n_layer - 1):             # fc stack (halving)
        out_dim = last // 2
        dims.append(out_dim)
        last = out_dim
    dims.append(n_y if classification else 1)  # final layer

    params = []
    for i in range(len(dims) - 1):
        fan_in, fan_out = dims[i], dims[i + 1]
        key, kw, kb = jax.random.split(key, 3)
        bound = 1.0 / (fan_in ** 0.5)
        w = jax.random.uniform(kw, (fan_in, fan_out), jnp.float32, -bound, bound)
        b = jax.random.uniform(kb, (1, fan_out), jnp.float32, -bound, bound)
        params.append((w, b))
    return params


def pick_compute_dtype():
    """bf16 everywhere: all elementwise work runs on the f32 MXU accumulator,
    and the MXU is bf16-native on v5e/v6e/v7x, so bf16 halves x1/x2 HBM
    traffic (the dominant bytes) with no VPU/EUP bf16 requirement."""
    return jnp.bfloat16


def prepare_cfmam_params(params, fold_mem=True, weight_dtype=jnp.bfloat16):
    """Fold mem_layer into the next Linear (inference only — mem_layer has no
    nonlinearity) and pack all weights / biases into single zero-padded,
    sublane/lane-aligned buffers.

    params: [(w, b)] with w (in, out), b (1, out); order = mem, fc..., final.
    Returns (w_buf, b_buf, layer_meta, e_pad, n_out).
      layer_meta[l] = (row_offset, in_pad, out_pad, relu); all offsets/dims are
      aligned so every in-kernel slice is a free view and every op unmasked.
    """
    n = len(params)
    relu_flags = [False] + [True] * (n - 2) + [False]
    if fold_mem and n >= 2:
        # TODO(synk): exact math but only valid with frozen weights (inference).
        (w_mem, b_mem), (w1, b1) = params[0], params[1]
        layers = [(w_mem @ w1, b_mem @ w1 + b1)] + list(params[2:])
        relu_flags = relu_flags[1:]
    else:
        layers = list(params)

    sub = 16 if weight_dtype == jnp.bfloat16 else 8   # sublane tile
    two_e = layers[0][0].shape[0]
    assert two_e % 2 == 0, "first layer must consume concat(x1, x2)"
    E = two_e // 2
    e_pad = _round_up(E, sub)
    n_out = layers[0 - 1][0].shape[1]

    out_pads = [_round_up(w.shape[1], 128) for w, _ in layers]
    width = max(out_pads)

    # Row layout: layer 0 = two e_pad halves; layer l>=1 consumes the previous
    # layer's 128-padded width (its padded rows hit exactly-zero h columns).
    rows, in_pads = [], []
    row = 0
    for li in range(len(layers)):
        in_pad = 2 * e_pad if li == 0 else out_pads[li - 1]
        row = _round_up(row, sub)
        rows.append(row)
        in_pads.append(in_pad)
        row += in_pad
    total_rows = _round_up(row, sub)

    w_buf = jnp.zeros((total_rows, width), jnp.float32)
    b_buf = jnp.zeros((len(layers), width), jnp.float32)
    meta = []
    for li, ((w, b), relu) in enumerate(zip(layers, relu_flags)):
        in_d, out_d = w.shape
        r = rows[li]
        if li == 0:
            w_buf = w_buf.at[r:r + E, :out_d].set(w[:E])
            w_buf = w_buf.at[r + e_pad:r + e_pad + E, :out_d].set(w[E:])
        else:
            w_buf = w_buf.at[r:r + in_d, :out_d].set(w)
        b_buf = b_buf.at[li, :out_d].set(b.reshape(-1))
        meta.append((r, in_pads[li], out_pads[li], bool(relu)))
    return w_buf.astype(weight_dtype), b_buf, tuple(meta), e_pad, n_out


def cfmam_forward(x1, x2, w_buf, b_buf, layer_meta, e_pad, n_out, *,
                  classification=True, block_rows=4096):
    B, E = x1.shape
    assert x2.shape == (B, E)
    assert layer_meta[0][1] == 2 * e_pad
    out_width = layer_meta[-1][2]           # 128-padded final width
    compute_dtype = w_buf.dtype

    # Batch tile: 128-aligned, large so per-step pipeline overhead amortizes,
    # but capped at ceil(B/2) so v7x's two TensorCores both get grid steps.
    tb = min(block_rows, _round_up((B + 1) // 2, 128))
    tb = _round_up(max(tb, 128), 128)
    pB = _round_up(B, tb)

    if pB != B or e_pad != E:
        pad = ((0, pB - B), (0, e_pad - E))
        x1 = jnp.pad(x1, pad)
        x2 = jnp.pad(x2, pad)
    x1 = x1.astype(compute_dtype)
    x2 = x2.astype(compute_dtype)

    kernel = functools.partial(_cfmam_kernel, layer_meta, e_pad, n_out,
                               classification)

    in_bytes = 2 * pB * e_pad * jnp.dtype(compute_dtype).itemsize
    w_bytes = (w_buf.size * jnp.dtype(compute_dtype).itemsize
               + b_buf.size * 4)
    out_bytes = pB * out_width * 4
    flops = 2 * pB * sum(in_d * out_d for _, in_d, out_d, _ in layer_meta)
    cost = pl.CostEstimate(flops=int(flops),
                           transcendentals=int(pB * out_width),
                           bytes_accessed=int(in_bytes + w_bytes + out_bytes))

    out = pl.pallas_call(
        kernel,
        out_shape=jax.ShapeDtypeStruct((pB, out_width), jnp.float32),
        grid=(pB // tb,),
        in_specs=[
            pl.BlockSpec((tb, e_pad), lambda i: (i, 0)),
            pl.BlockSpec((tb, e_pad), lambda i: (i, 0)),
            pl.BlockSpec(w_buf.shape, lambda i: (0, 0)),   # resident across grid
            pl.BlockSpec(b_buf.shape, lambda i: (0, 0)),   # resident across grid
        ],
        out_specs=pl.BlockSpec((tb, out_width), lambda i: (i, 0)),
        compiler_params=pltpu.CompilerParams(
            dimension_semantics=("parallel",),
            # Big tiles need more than v5e's 16 MiB default scoped VMEM; 48 MiB
            # still leaves headroom under v7x's 64 MiB physical VMEM.
            vmem_limit_bytes=48 * 1024 * 1024),
        cost_estimate=cost,
    )(x1, x2, w_buf, b_buf)
    return out[:B, :n_out]


def cfmam_reference(x1, x2, params, classification=True):
    """Pure-JAX reference replicating the PyTorch module exactly (unfolded)."""
    h = jnp.concatenate([x1, x2], axis=1).astype(jnp.float32)
    w, b = params[0]
    h = h @ w + b                      # mem_layer, no activation
    for w, b in params[1:-1]:          # fc stack, ReLU
        h = jnp.maximum(h @ w + b, 0.0)
    w, b = params[-1]                  # final layer
    z = h @ w + b
    return jax.nn.softmax(z, axis=-1) if classification else jax.nn.sigmoid(z)


if __name__ == "__main__":
    embedding_dim = 16   # -> input_size = 32
    n_y = 4
    n_layer = 3          # fc: 32->16 (ReLU), 16->8 (ReLU); final: 8->n_y
    batch = 8

    key = jax.random.PRNGKey(0)
    kp, k1, k2 = jax.random.split(key, 3)
    params = init_cfmam_params(kp, embedding_dim, n_y, n_layer, classification=True)

    x1 = jax.random.normal(k1, (batch, embedding_dim), jnp.float32)
    x2 = jax.random.normal(k2, (batch, embedding_dim), jnp.float32)

    compute_dtype = pick_compute_dtype()
    w_buf, b_buf, layer_meta, e_pad, n_out = prepare_cfmam_params(
        params, fold_mem=True, weight_dtype=compute_dtype)

    out = cfmam_forward(x1, x2, w_buf, b_buf, layer_meta, e_pad, n_out,
                        classification=True)
    out = jax.block_until_ready(out)

    ref = cfmam_reference(x1, x2, params, classification=True)
    assert out.shape == (batch, n_y), out.shape
    # Tolerance accounts for bf16 inputs/weights and the mem-layer fold
    # reassociation (softmax outputs live in [0, 1]).
    tol = 5e-2
    assert jnp.allclose(out, ref, atol=tol, rtol=tol), "mismatch vs reference"

    print("KERNEL_OK")
</pallas_src>

<mosaic_0001>
module attributes {stable_mosaic.version = 11 : i64} {
  func.func @_cfmam_kernel(%arg0: i32, %arg1: memref<128x16xbf16, #tpu.memory_space<vmem>>, %arg2: memref<128x16xbf16, #tpu.memory_space<vmem>>, %arg3: memref<288x128xbf16, #tpu.memory_space<vmem>>, %arg4: memref<3x128xf32, #tpu.memory_space<vmem>>, %arg5: memref<128x128xf32, #tpu.memory_space<vmem>>) attributes {dimension_semantics = [#tpu.dimension_semantics<parallel>], iteration_bounds = array<i64: 1>, scalar_prefetch = 0 : i64, scratch_operands = 0 : i64, tpu.core_type = #tpu.core_type<tc>, window_params = [{transform_indices = @transform_0, window_bounds = array<i64: 128, 16>}, {transform_indices = @transform_1, window_bounds = array<i64: 128, 16>}, {pipeline_mode = #tpu.pipeline_mode<synchronous>, transform_indices = @transform_2, window_bounds = array<i64: 288, 128>}, {pipeline_mode = #tpu.pipeline_mode<synchronous>, transform_indices = @transform_3, window_bounds = array<i64: 3, 128>}, {transform_indices = @transform_4, window_bounds = array<i64: 128, 128>}]} {
    %c0 = arith.constant 0 : index
    %c0_0 = arith.constant 0 : index
    %0 = vector.load %arg3[%c0, %c0_0] : memref<288x128xbf16, #tpu.memory_space<vmem>>, vector<16x128xbf16>
    %c16 = arith.constant 16 : index
    %c0_1 = arith.constant 0 : index
    %1 = vector.load %arg3[%c16, %c0_1] : memref<288x128xbf16, #tpu.memory_space<vmem>>, vector<16x128xbf16>
    %c0_2 = arith.constant 0 : index
    %c0_3 = arith.constant 0 : index
    %2 = vector.load %arg1[%c0_2, %c0_3] : memref<128x16xbf16, #tpu.memory_space<vmem>>, vector<128x16xbf16>
    %cst = arith.constant dense<0.000000e+00> : vector<128x128xf32>
    %3 = tpu.matmul %2, %0, %cst {dimension_numbers = #tpu.dot_dimension_numbers<[1], [0], [0], [1], [0, 0, 1, 1], [], []>} : vector<128x16xbf16>, vector<16x128xbf16>, vector<128x128xf32> -> vector<128x128xf32>
    %c0_4 = arith.constant 0 : index
    %c0_5 = arith.constant 0 : index
    %4 = vector.load %arg2[%c0_4, %c0_5] : memref<128x16xbf16, #tpu.memory_space<vmem>>, vector<128x16xbf16>
    %cst_6 = arith.constant dense<0.000000e+00> : vector<128x128xf32>
    %5 = tpu.matmul %4, %1, %cst_6 {dimension_numbers = #tpu.dot_dimension_numbers<[1], [0], [0], [1], [0, 0, 1, 1], [], []>} : vector<128x16xbf16>, vector<16x128xbf16>, vector<128x128xf32> -> vector<128x128xf32>
    %6 = arith.addf %3, %5 : vector<128x128xf32>
    %c0_7 = arith.constant 0 : index
    %c0_8 = arith.constant 0 : index
    %7 = vector.load %arg4[%c0_7, %c0_8] : memref<3x128xf32, #tpu.memory_space<vmem>>, vector<1x128xf32>
    %8 = vector.broadcast %7 : vector<1x128xf32> to vector<128x128xf32>
    %9 = arith.addf %6, %8 : vector<128x128xf32>
    %cst_9 = arith.constant 0.000000e+00 : f32
    %10 = vector.broadcast %cst_9 : f32 to vector<128x128xf32>
    %11 = arith.maximumf %9, %10 : vector<128x128xf32>
    %c32 = arith.constant 32 : index
    %c0_10 = arith.constant 0 : index
    %12 = vector.load %arg3[%c32, %c0_10] : memref<288x128xbf16, #tpu.memory_space<vmem>>, vector<128x128xbf16>
    %13 = arith.truncf %11 : vector<128x128xf32> to vector<128x128xbf16>
    %cst_11 = arith.constant dense<0.000000e+00> : vector<128x128xf32>
    %14 = tpu.matmul %13, %12, %cst_11 {dimension_numbers = #tpu.dot_dimension_numbers<[1], [0], [0], [1], [0, 0, 1, 1], [], []>} : vector<128x128xbf16>, vector<128x128xbf16>, vector<128x128xf32> -> vector<128x128xf32>
    %c1 = arith.constant 1 : index
    %c0_12 = arith.constant 0 : index
    %15 = vector.load %arg4[%c1, %c0_12] : memref<3x128xf32, #tpu.memory_space<vmem>>, vector<1x128xf32>
    %16 = vector.broadcast %15 : vector<1x128xf32> to vector<128x128xf32>
    %17 = arith.addf %14, %16 : vector<128x128xf32>
    %cst_13 = arith.constant 0.000000e+00 : f32
    %18 = vector.broadcast %cst_13 : f32 to vector<128x128xf32>
    %19 = arith.maximumf %17, %18 : vector<128x128xf32>
    %c160 = arith.constant 160 : index
    %c0_14 = arith.constant 0 : index
    %20 = vector.load %arg3[%c160, %c0_14] : memref<288x128xbf16, #tpu.memory_space<vmem>>, vector<128x128xbf16>
    %21 = arith.truncf %19 : vector<128x128xf32> to vector<128x128xbf16>
    %cst_15 = arith.constant dense<0.000000e+00> : vector<128x128xf32>
    %22 = tpu.matmul %21, %20, %cst_15 {dimension_numbers = #tpu.dot_dimension_numbers<[1], [0], [0], [1], [0, 0, 1, 1], [], []>} : vector<128x128xbf16>, vector<128x128xbf16>, vector<128x128xf32> -> vector<128x128xf32>
    %c2 = arith.constant 2 : index
    %c0_16 = arith.constant 0 : index
    %23 = vector.load %arg4[%c2, %c0_16] : memref<3x128xf32, #tpu.memory_space<vmem>>, vector<1x128xf32>
    %24 = vector.broadcast %23 : vector<1x128xf32> to vector<128x128xf32>
    %25 = arith.addf %22, %24 : vector<128x128xf32>
    %26 = tpu.iota {dimensions = array<i32: 1>} : vector<1x128xi32>
    %c4_i32 = arith.constant 4 : i32
    %27 = vector.broadcast %c4_i32 : i32 to vector<1x128xi32>
    %28 = arith.cmpi slt, %26, %27 : vector<1x128xi32>
    %cst_17 = arith.constant -1.000000e+30 : f32
    %29 = vector.shape_cast %28 : vector<1x128xi1> to vector<1x128xi1>
    %30 = vector.broadcast %29 : vector<1x128xi1> to vector<128x128xi1>
    %31 = vector.broadcast %cst_17 : f32 to vector<128x128xf32>
    %32 = arith.select %30, %25, %31 : vector<128x128xi1>, vector<128x128xf32>
    %cst_18 = arith.constant dense<0xFF800000> : vector<128xf32>
    %33 = vector.multi_reduction <maximumf>, %32, %cst_18 [1] : vector<128x128xf32> to vector<128xf32>
    %34 = vector.shape_cast %33 : vector<128xf32> to vector<128x1xf32>
    %35 = vector.broadcast %34 : vector<128x1xf32> to vector<128x128xf32>
    %36 = arith.subf %32, %35 : vector<128x128xf32>
    %37 = math.exp %36 : vector<128x128xf32>
    %cst_19 = arith.constant dense<0.000000e+00> : vector<128xf32>
    %38 = vector.multi_reduction <add>, %37, %cst_19 [1] : vector<128x128xf32> to vector<128xf32>
    %39 = vector.shape_cast %38 : vector<128xf32> to vector<128x1xf32>
    %40 = vector.broadcast %39 : vector<128x1xf32> to vector<128x128xf32>
    %41 = arith.divf %37, %40 : vector<128x128xf32>
    %c0_20 = arith.constant 0 : index
    %c0_21 = arith.constant 0 : index
    %42 = vector.load %arg5[%c0_20, %c0_21] : memref<128x128xf32, #tpu.memory_space<vmem>>, vector<128x128xf32>
    tpu.vector_store %arg5[%c0_20, %c0_21], %41 {strides = array<i32>} : memref<128x128xf32, #tpu.memory_space<vmem>>, vector<128x128xf32>,
    return
  }
  func.func @transform_0(%arg0: i32) -> (i32, i32) {
    %c0_i32 = arith.constant 0 : i32
    %c0_i32_0 = arith.constant 0 : i32
    return %arg0, %c0_i32 : i32, i32
  }
  func.func @transform_1(%arg0: i32) -> (i32, i32) {
    %c0_i32 = arith.constant 0 : i32
    %c0_i32_0 = arith.constant 0 : i32
    return %arg0, %c0_i32 : i32, i32
  }
  func.func @transform_2(%arg0: i32) -> (i32, i32) {
    %c0_i32 = arith.constant 0 : i32
    %c0_i32_0 = arith.constant 0 : i32
    %c0_i32_1 = arith.constant 0 : i32
    return %c0_i32, %c0_i32_0 : i32, i32
  }
  func.func @transform_3(%arg0: i32) -> (i32, i32) {
    %c0_i32 = arith.constant 0 : i32
    %c0_i32_0 = arith.constant 0 : i32
    %c0_i32_1 = arith.constant 0 : i32
    return %c0_i32, %c0_i32_0 : i32, i32
  }
  func.func @transform_4(%arg0: i32) -> (i32, i32) {
    %c0_i32 = arith.constant 0 : i32
    %c0_i32_0 = arith.constant 0 : i32
    return %arg0, %c0_i32 : i32, i32
  }
}

</mosaic_0001>

<bundles_post_ra>
// kernel: tpu_custom_call.1
= control target key start
LH: loop header
LB: loop body
LE: loop exit
PB: predicated region body
PF: predicated region fallthrough
CT: control target
= control target key end

     0   :  { %vm101_vm0 = vcmask 130048   ;;  %s1633_s0 = inlined_call_operand.vmem [shape: bf16[128,16], index: 0, kind: input, shape index: {}]   ;;  %s1634_s1 = inlined_call_operand.vmem [shape: bf16[128,16], index: 1, kind: input, shape index: {}]   ;;  %s1635_s2 = inlined_call_operand.vmem [shape: bf16[288,128], index: 2, kind: input, shape index: {}]   ;;  %s1636_s3 = inlined_call_operand.vmem [shape: f32[3,128], index: 3, kind: input, shape index: {}]   ;;  %s1637_s4 = inlined_call_operand.hbm [shape: f32[128,128], index: 4, kind: output, shape index: {}]  }
   0x1   :  { %v1194_v0 = vld [vmem:[%s1635_s2 + $0x8] sm:$0xff]   ;;  %v1195_v1 = vld [vmem:[%s1635_s2] sm:$0xff]   ;;  %v1200_v6 = vld [vmem:[%s1634_s1 + $0x10] sm:$0xff]  }
   0x2   :  { %1091 = vmatprep.subr.bf16.mxu0 %v1194_v0  ;;  %v1196_v2 = vld [vmem:[%s1634_s1] sm:$0xff]   ;;  %1109 = vmatprep.subr.bf16.mxu1 %v1195_v1  ;;  %v1198_v4 = vld [vmem:[%s1634_s1 + $0x8] sm:$0xff]   ;;  %v1201_v7 = vld [vmem:[%s1633_s0 + $0x10] sm:$0xff]  }
   0x3   :  { %1092 = vmatpush3.bf16.msra.mxu0 %v1194_v0  ;;  %v1197_v3 = vld [vmem:[%s1633_s0] sm:$0xff]   ;;  %1110 = vmatpush3.bf16.msra.mxu1 %v1195_v1  ;;  %v1199_v5 = vld [vmem:[%s1633_s0 + $0x8] sm:$0xff]   ;;  %v1202_v8 = vld [vmem:[%s1634_s1 + $0x18] sm:$0xff]  }
   0x4   :  { %1093 = vmatprep.mubr.msk.bf16.mxu0 %vm101_vm0, %v1196_v2  ;;  %1111 = vmatprep.mubr.msk.bf16.mxu1 %vm101_vm0, %v1197_v3  ;;  %v1203_v9 = vld [vmem:[%s1633_s0 + $0x18] sm:$0xff]   ;;  %v1204_v10 = vld [vmem:[%s1634_s1 + $0x20] sm:$0xff]   ;;  %v1206_v12 = vld [vmem:[%s1634_s1 + $0x28] sm:$0xff]  }
   0x5   :  { %v1205_v11 = vld [vmem:[%s1633_s0 + $0x20] sm:$0xff]   ;;  %v1207_v13 = vld [vmem:[%s1633_s0 + $0x28] sm:$0xff]   ;;  %v1208_v14 = vld [vmem:[%s1634_s1 + $0x30] sm:$0xff]  }
   0x6   :  { %1094 = vmatmul.mubr.msk.bf16.vlgmr.msra.gmra.mxu0 %vm101_vm0, %v1198_v4  ;;  %1112 = vmatmul.mubr.msk.bf16.vlgmr.msra.gmra.mxu1 %vm101_vm0, %v1199_v5  ;;  %v1212_v15 = vld [vmem:[%s1635_s2 + $0x48] sm:$0xff]   ;;  %v1213_v16 = vld [vmem:[%s1635_s2 + $0x40] sm:$0xff]   ;;  %v1209_v17 = vld [vmem:[%s1633_s0 + $0x30] sm:$0xff]  }
   0x7   :  { %1097 = vmatprep.mubr.msk.bf16.mxu0 %vm101_vm0, %v1200_v6  ;;  %1115 = vmatprep.mubr.msk.bf16.mxu1 %vm101_vm0, %v1201_v7  ;;  %v1214_v18 = vld [vmem:[%s1635_s2 + $0x38] sm:$0xff]   ;;  %v1215_v20 = vld [vmem:[%s1635_s2 + $0x30] sm:$0xff]   ;;  %v1216_v22 = vld [vmem:[%s1635_s2 + $0x28] sm:$0xff]  }
   0x8   :  { %1127 = vmatprep.subr.bf16.mxu0 %v1212_v15  ;;  %v1210_v19 = vld [vmem:[%s1634_s1 + $0x38] sm:$0xff]  }
   0x9   :  { %1128 = vmatpush3.bf16.msra.mxu0 %v1212_v15  ;;  %v1211_v21 = vld [vmem:[%s1633_s0 + $0x38] sm:$0xff]  }
   0xa   :  { %1129 = vmatprep.subr.bf16.mxu0 %v1213_v16 }
   0xd   :  { %1130 = vmatpush3.bf16.msra.mxu0 %v1213_v16 }
   0xe   :  { %1098 = vmatmul.mubr.msk.bf16.gmra.mxu0 %vm101_vm0, %v1202_v8  ;;  %1116 = vmatmul.mubr.msk.bf16.gmra.mxu1 %vm101_vm0, %v1203_v9 }
   0xf   :  { %1101 = vmatprep.mubr.msk.bf16.mxu0 %vm101_vm0, %v1204_v10  ;;  %1119 = vmatprep.mubr.msk.bf16.mxu1 %vm101_vm0, %v1205_v11 }
  0x10   :  { %1131 = vmatprep.subr.bf16.mxu0 %v1214_v18 }
  0x11   :  { %1132 = vmatpush3.bf16.msra.mxu0 %v1214_v18 }
  0x12   :  { %1133 = vmatprep.subr.bf16.mxu0 %v1215_v20 }
  0x16   :  { %1102 = vmatmul.mubr.msk.bf16.gmra.mxu0 %vm101_vm0, %v1206_v12  ;;  %1120 = vmatmul.mubr.msk.bf16.gmra.mxu1 %vm101_vm0, %v1207_v13 }
  0x17   :  { %1105 = vmatprep.mubr.msk.bf16.mxu0 %vm101_vm0, %v1208_v14  ;;  %1123 = vmatprep.mubr.msk.bf16.mxu1 %vm101_vm0, %v1209_v17 }
  0x1e   :  { %1106 = vmatmul.mubr.msk.bf16.gmra.mxu0 %vm101_vm0, %v1210_v19 }
  0x1f   :  { %9 = vsyncpa [#allocation3], 0  ;;  %1124 = vmatmul.mubr.msk.bf16.gmra.mxu1 %vm101_vm0, %v1211_v21  ;;  %1134 = vmatpush3.bf16.msra.mxu0 %v1215_v20  ;;  %v1217_v23 = vld [vmem:[%s1635_s2 + $0x20] sm:$0xff]   ;;  %v1218_v24 = vld [vmem:[%s1635_s2 + $0x18] sm:$0xff]  }
  0x20   :  { %1135 = vmatprep.subr.bf16.mxu0 %v1216_v22  ;;  %v1219_v25 = vld [vmem:[%s1635_s2 + $0x10] sm:$0xff]   ;;  %v1220_v26 = vld [vmem:[%s1635_s2 + $0x88] sm:$0xff]   ;;  %v1221_v27 = vld [vmem:[%s1635_s2 + $0x80] sm:$0xff]  }
  0x21   :  { %1159 = vmatprep.subr.bf16.mxu1 %v1220_v26  ;;  %v1222_v28 = vld [vmem:[%s1635_s2 + $0x78] sm:$0xff]   ;;  %v1223_v29 = vld [vmem:[%s1635_s2 + $0x70] sm:$0xff]   ;;  %v1224_v30 = vld [vmem:[%s1635_s2 + $0x68] sm:$0xff]  }
  0x22   :  { %1160 = vmatpush3.bf16.msra.mxu1 %v1220_v26  ;;  %v1454_v39 = vld [vmem:[%s1636_s3] ss:$0 sm:$0xff] }
  0x23   :  { %1136 = vmatpush3.bf16.msra.mxu0 %v1216_v22  ;;  %1161 = vmatprep.subr.bf16.mxu1 %v1221_v27 }
  0x24   :  { %1137 = vmatprep.subr.bf16.mxu0 %v1217_v23 }
  0x26   :  { %1162 = vmatpush3.bf16.msra.mxu1 %v1221_v27 }
  0x27   :  { %1138 = vmatpush3.bf16.msra.mxu0 %v1217_v23  ;;  %1163 = vmatprep.subr.bf16.mxu1 %v1222_v28 }
  0x28   :  { %1139 = vmatprep.subr.bf16.mxu0 %v1218_v24 }
  0x2a   :  { %1164 = vmatpush3.bf16.msra.mxu1 %v1222_v28 }
  0x2b   :  { %1140 = vmatpush3.bf16.msra.mxu0 %v1218_v24  ;;  %1165 = vmatprep.subr.bf16.mxu1 %v1223_v29 }
  0x2c   :  { %1141 = vmatprep.subr.bf16.mxu0 %v1219_v25 }
  0x2e   :  { %1166 = vmatpush3.bf16.msra.mxu1 %v1223_v29 }
  0x2f   :  { %1142 = vmatpush3.bf16.msra.mxu0 %v1219_v25  ;;  %1167 = vmatprep.subr.bf16.mxu1 %v1224_v30 }
  0x32   :  { %1168 = vmatpush3.bf16.msra.mxu1 %v1224_v30 }
  0xc6   :  { %v1095_v31 = vpop.f32.mrf.mxu0  ;;  %v1113_v32 = vpop.f32.mrf.mxu1 }
  0xc7   :  { %v336_v37 = vadd.f32 %v1113_v32, %v1095_v31 }
  0xc8   :  { %v160_v33 = vpop.f32.mrf.mxu0  ;;  %v327_v34 = vpop.f32.mrf.mxu1 }
  0xc9   :  { %v328_v35 = vadd.f32 %v327_v34, %v160_v33  ;;  %v397_v47 = vadd.f32 %v1454_v39, %v336_v37 }
  0xca   :  { %v1096_v36 = vpop.f32.mrf.mxu0  ;;  %v1114_v38 = vpop.f32.mrf.mxu1 }
  0xcb   :  { %v339_v40 = vadd.f32 %v1114_v38, %v1096_v36  ;;  %v395_v43 = vadd.f32 %v1454_v39, %v328_v35  ;;  %v413_v57 = vmax.f32 %v397_v47, 0.0 }
  0xcc   :  { %v163_v41 = vpop.f32.mrf.mxu0  ;;  %v330_v42 = vpop.f32.mrf.mxu1 }
  0xcd   :  { %v398_v44 = vadd.f32 %v1454_v39, %v339_v40  ;;  %v331_v45 = vadd.f32 %v330_v42, %v163_v41  ;;  %v411_v53 = vmax.f32 %v395_v43, 0.0 }
  0xce   :  { %v1099_v46 = vpop.f32.mrf.mxu0  ;;  %v1117_v48 = vpop.f32.mrf.mxu1 }
  0xcf   :  { %v396_v49 = vadd.f32 %v1454_v39, %v331_v45  ;;  %v414_v51 = vmax.f32 %v398_v44, 0.0  ;;  %v352_v58 = vadd.f32 %v1117_v48, %v1099_v46 }
  0xd0   :  { %v176_v50 = vpop.f32.mrf.mxu0  ;;  %v343_v52 = vpop.f32.mrf.mxu1 }
  0xd1   :  { %v412_v54 = vmax.f32 %v396_v49, 0.0  ;;  %v344_v55 = vadd.f32 %v343_v52, %v176_v50  ;;  %v444_v63 = vpack.c.bf16 %v414_v51, %v413_v57  ;;  %v401_v5 = vadd.f32 %v1454_v39, %v352_v58  ;;  %v1225_v57 = vld [vmem:[%s1635_s2 + $0x60] sm:$0xff]   ;;  %v1226_v58 = vld [vmem:[%s1635_s2 + $0x58] sm:$0xff]  }
  0xd2   :  { %v1100_v56 = vpop.f32.mrf.mxu0  ;;  %v1118_v59 = vpop.f32.mrf.mxu1  ;;  %1169 = vmatprep.subr.bf16.mxu1 %v1225_v57 }
  0xd3   :  { %v355_v60 = vadd.f32 %v1118_v59, %v1100_v56  ;;  %v443_v62 = vpack.c.bf16 %v412_v54, %v411_v53  ;;  %v399_v1 = vadd.f32 %v1454_v39, %v344_v55  ;;  %v417_v15 = vmax.f32 %v401_v5, 0.0  ;;  %1170 = vmatpush3.bf16.msra.mxu1 %v1225_v57 }
  0xd4   :  { %v179_v61 = vpop.f32.mrf.mxu0  ;;  %v346_v0 = vpop.f32.mrf.mxu1  ;;  %1171 = vmatprep.subr.bf16.mxu1 %v1226_v58 }
  0xd5   :  { %v402_v2 = vadd.f32 %v1454_v39, %v355_v60  ;;  %v347_v3 = vadd.f32 %v346_v0, %v179_v61  ;;  %1143 = vmatprep.mubr.bf16.mxu0 %v443_v62  ;;  %v415_v11 = vmax.f32 %v399_v1, 0.0  ;;  %v1023_v61 = vld [vmem:[%s1636_s3 + $0x1] ss:$0 sm:$0xff] }
  0xd6   :  { %v1103_v4 = vpop.f32.mrf.mxu0  ;;  %v1121_v6 = vpop.f32.mrf.mxu1  ;;  %1144 = vmatmul.mubr.bf16.vlgmr.msra.gmra.mxu0 %v444_v63 }
  0xd7   :  { %v400_v7 = vadd.f32 %v1454_v39, %v347_v3  ;;  %v418_v9 = vmax.f32 %v402_v2, 0.0  ;;  %v368_v16 = vadd.f32 %v1121_v6, %v1103_v4  ;;  %1172 = vmatpush3.bf16.msra.mxu1 %v1226_v58 }
  0xd8   :  { %v192_v8 = vpop.f32.mrf.mxu0  ;;  %v359_v10 = vpop.f32.mrf.mxu1 }
  0xd9   :  { %v416_v12 = vmax.f32 %v400_v7, 0.0  ;;  %v360_v13 = vadd.f32 %v359_v10, %v192_v8  ;;  %v446_v22 = vpack.c.bf16 %v418_v9, %v417_v15  ;;  %v405_v27 = vadd.f32 %v1454_v39, %v368_v16 }
  0xda   :  { %v1104_v14 = vpop.f32.mrf.mxu0  ;;  %v1122_v17 = vpop.f32.mrf.mxu1 }
  0xdb   :  { %v371_v18 = vadd.f32 %v1122_v17, %v1104_v14  ;;  %v445_v20 = vpack.c.bf16 %v416_v12, %v415_v11  ;;  %v403_v23 = vadd.f32 %v1454_v39, %v360_v13  ;;  %v421_v37 = vmax.f32 %v405_v27, 0.0 }
  0xdc   :  { %v195_v19 = vpop.f32.mrf.mxu0  ;;  %v362_v21 = vpop.f32.mrf.mxu1 }
  0xdd   :  { %v406_v24 = vadd.f32 %v1454_v39, %v371_v18  ;;  %v363_v25 = vadd.f32 %v362_v21, %v195_v19  ;;  %1147 = vmatprep.mubr.bf16.mxu0 %v445_v20  ;;  %v419_v33 = vmax.f32 %v403_v23, 0.0 }
  0xde   :  { %v1107_v26 = vpop.f32.mrf.mxu0  ;;  %1148 = vmatmul.mubr.bf16.gmra.mxu0 %v446_v22 }
  0xdf   :  { %v1125_v28 = vpop.f32.mrf.mxu1  ;;  %v404_v29 = vadd.f32 %v1454_v39, %v363_v25  ;;  %v422_v31 = vmax.f32 %v406_v24, 0.0 }
  0xe0   :  { %v208_v30 = vpop.f32.mrf.mxu0  ;;  %v384_v38 = vadd.f32 %v1125_v28, %v1107_v26 }
  0xe1   :  { %v375_v32 = vpop.f32.mrf.mxu1  ;;  %v420_v34 = vmax.f32 %v404_v29, 0.0  ;;  %v448_v45 = vpack.c.bf16 %v422_v31, %v421_v37 }
  0xe2   :  { %v376_v35 = vadd.f32 %v375_v32, %v208_v30  ;;  %v1108_v36 = vpop.f32.mrf.mxu0  ;;  %v409_v49 = vadd.f32 %v1454_v39, %v384_v38 }
  0xe3   :  { %v1126_v40 = vpop.f32.mrf.mxu1  ;;  %v447_v43 = vpack.c.bf16 %v420_v34, %v419_v33 }
  0xe4   :  { %v387_v41 = vadd.f32 %v1126_v40, %v1108_v36  ;;  %v211_v42 = vpop.f32.mrf.mxu0  ;;  %v407_v46 = vadd.f32 %v1454_v39, %v376_v35  ;;  %v425_v54 = vmax.f32 %v409_v49, 0.0 }
  0xe5   :  { %v378_v44 = vpop.f32.mrf.mxu1  ;;  %1151 = vmatprep.mubr.bf16.mxu0 %v447_v43 }
  0xe6   :  { %v410_v47 = vadd.f32 %v1454_v39, %v387_v41  ;;  %v379_v48 = vadd.f32 %v378_v44, %v211_v42  ;;  %1152 = vmatmul.mubr.bf16.gmra.mxu0 %v448_v45  ;;  %v423_v52 = vmax.f32 %v407_v46, 0.0 }
  0xe8   :  { %v408_v50 = vadd.f32 %v1454_v39, %v379_v48  ;;  %v426_v51 = vmax.f32 %v410_v47, 0.0  ;;  %v1227_v39 = vld [vmem:[%s1635_s2 + $0x50] sm:$0xff]  }
  0xe9   :  { %1173 = vmatprep.subr.bf16.mxu1 %v1227_v39 }
  0xea   :  { %v424_v53 = vmax.f32 %v408_v50, 0.0  ;;  %v450_v56 = vpack.c.bf16 %v426_v51, %v425_v54  ;;  %1174 = vmatpush3.bf16.msra.mxu1 %v1227_v39 }
  0xec   :  { %v449_v55 = vpack.c.bf16 %v424_v53, %v423_v52  ;;  %v791_v53 = vlaneseq }
  0xee   :  { %1155 = vmatprep.mubr.bf16.mxu0 %v449_v55  ;;  %v1484_v54 = vand.u32 127, %v791_v53  ;;  %v1032_v55 = vld [vmem:[%s1636_s3 + $0x2] ss:$0 sm:$0xff]  ;;  %s1314_s3 = smov [#allocation2]  }
  0xef   :  { %1156 = vmatmul.mubr.bf16.gmra.mxu0 %v450_v56  ;;  %s977_s8 = sshll.u32 %s1314_s3, 4  ;;  %s978_s8 = int_to_ptr.vmem [resolvable:$true] %s977_s8 }
  0xf0   :  { %vm793_vm1 = vcmp.lt.s32.totalorder %v1484_v54, 4  ;;  %s1292_s1 = scalar_lea.vmem %s978_s8, 2048  ;;  %p1297_p1 = scmp.lt.s32.totalorder %s978_s8, %s978_s8 }
  0xf1   :  { %p1293_p0 = scmp.ne.s32.totalorder %s978_s8, %s1292_s1  ;;  %p1298_p2 = scmp.lt.s32.totalorder %s1292_s1, %s1292_s1 }
  0xf3   :  { %p1299_p3 = por %p1298_p2, %p1297_p1 }
  0xf5   :  { %p1300_p4 = pnand %p1299_p3, %p1293_p0 }
 0x196   :  { %v1145_v59 = vpop.f32.mrf.mxu0 }
 0x197   :  { %v547_v1 = vadd.f32 %v1145_v59, %v1023_v61 }
 0x198   :  { %v538_v60 = vpop.f32.mrf.mxu0 }
 0x199   :  { %v539_v63 = vadd.f32 %v1023_v61, %v538_v60  ;;  %v603_v8 = vmax.f32 %v547_v1, 0.0 }
 0x19a   :  { %v1146_v62 = vpop.f32.mrf.mxu0 }
 0x19b   :  { %v550_v0 = vadd.f32 %v1146_v62, %v1023_v61  ;;  %v601_v6 = vmax.f32 %v539_v63, 0.0 }
 0x19c   :  { %v541_v2 = vpop.f32.mrf.mxu0 }
 0x19d   :  { %v542_v3 = vadd.f32 %v1023_v61, %v541_v2  ;;  %v604_v4 = vmax.f32 %v550_v0, 0.0 }
 0x19e   :  { %v1149_v5 = vpop.f32.mrf.mxu0 }
 0x19f   :  { %v602_v7 = vmax.f32 %v542_v3, 0.0  ;;  %v634_v11 = vpack.c.bf16 %v604_v4, %v603_v8  ;;  %v563_v15 = vadd.f32 %v1149_v5, %v1023_v61 }
 0x1a0   :  { %v554_v9 = vpop.f32.mrf.mxu0 }
 0x1a1   :  { %v633_v10 = vpack.c.bf16 %v602_v7, %v601_v6  ;;  %v555_v13 = vadd.f32 %v1023_v61, %v554_v9  ;;  %v607_v22 = vmax.f32 %v563_v15, 0.0 }
 0x1a2   :  { %v1150_v12 = vpop.f32.mrf.mxu0 }
 0x1a3   :  { %v566_v14 = vadd.f32 %v1150_v12, %v1023_v61  ;;  %1175 = vmatprep.mubr.bf16.mxu1 %v633_v10  ;;  %v605_v20 = vmax.f32 %v555_v13, 0.0 }
 0x1a4   :  { %v557_v16 = vpop.f32.mrf.mxu0  ;;  %1176 = vmatmul.mubr.bf16.vlgmr.msra.gmra.mxu1 %v634_v11 }
 0x1a5   :  { %v558_v17 = vadd.f32 %v1023_v61, %v557_v16  ;;  %v608_v18 = vmax.f32 %v566_v14, 0.0 }
 0x1a6   :  { %v1153_v19 = vpop.f32.mrf.mxu0 }
 0x1a7   :  { %v606_v21 = vmax.f32 %v558_v17, 0.0  ;;  %v636_v25 = vpack.c.bf16 %v608_v18, %v607_v22  ;;  %v579_v29 = vadd.f32 %v1153_v19, %v1023_v61 }
 0x1a8   :  { %v570_v23 = vpop.f32.mrf.mxu0 }
 0x1a9   :  { %v635_v24 = vpack.c.bf16 %v606_v21, %v605_v20  ;;  %v571_v27 = vadd.f32 %v1023_v61, %v570_v23  ;;  %v611_v36 = vmax.f32 %v579_v29, 0.0 }
 0x1aa   :  { %v1154_v26 = vpop.f32.mrf.mxu0 }
 0x1ab   :  { %v582_v28 = vadd.f32 %v1154_v26, %v1023_v61  ;;  %1179 = vmatprep.mubr.bf16.mxu1 %v635_v24  ;;  %v609_v34 = vmax.f32 %v571_v27, 0.0 }
 0x1ac   :  { %v573_v30 = vpop.f32.mrf.mxu0  ;;  %1180 = vmatmul.mubr.bf16.gmra.mxu1 %v636_v25 }
 0x1ad   :  { %v574_v31 = vadd.f32 %v1023_v61, %v573_v30  ;;  %v612_v32 = vmax.f32 %v582_v28, 0.0 }
 0x1af   :  { %v1157_v33 = vpop.f32.mrf.mxu0  ;;  %v610_v35 = vmax.f32 %v574_v31, 0.0  ;;  %v638_v40 = vpack.c.bf16 %v612_v32, %v611_v36 }
 0x1b0   :  { %v595_v44 = vadd.f32 %v1157_v33, %v1023_v61 }
 0x1b1   :  { %v586_v37 = vpop.f32.mrf.mxu0  ;;  %v637_v38 = vpack.c.bf16 %v610_v35, %v609_v34 }
 0x1b2   :  { %v587_v42 = vadd.f32 %v1023_v61, %v586_v37  ;;  %v615_v50 = vmax.f32 %v595_v44, 0.0 }
 0x1b3   :  { %v1158_v41 = vpop.f32.mrf.mxu0  ;;  %1183 = vmatprep.mubr.bf16.mxu1 %v637_v38 }
 0x1b4   :  { %v598_v43 = vadd.f32 %v1158_v41, %v1023_v61  ;;  %1184 = vmatmul.mubr.bf16.gmra.mxu1 %v638_v40  ;;  %v613_v48 = vmax.f32 %v587_v42, 0.0 }
 0x1b5   :  { %v589_v45 = vpop.f32.mrf.mxu0 }
 0x1b6   :  { %v590_v46 = vadd.f32 %v1023_v61, %v589_v45  ;;  %v616_v47 = vmax.f32 %v598_v43, 0.0 }
 0x1b8   :  { %v614_v49 = vmax.f32 %v590_v46, 0.0  ;;  %v640_v52 = vpack.c.bf16 %v616_v47, %v615_v50 }
 0x1ba   :  { %v639_v51 = vpack.c.bf16 %v614_v49, %v613_v48 }
 0x1bc   :  { %1187 = vmatprep.mubr.bf16.mxu1 %v639_v51 }
 0x1bd   :  { %1188 = vmatmul.mubr.bf16.gmra.mxu1 %v640_v52 }
 0x264   :  { %v1177_v56 = vpop.f32.mrf.mxu1 }
 0x265   :  { %v737_v57 = vadd.f32 %v1177_v56, %v1032_v55 }
 0x266   :  { %v728_v58 = vpop.f32.mrf.mxu1 }
 0x267   :  { %v729_v39 = vadd.f32 %v1032_v55, %v728_v58  ;;  %v1492_v59 = vsel %vm793_vm1, %v737_v57, -1e+30 }
 0x268   :  { %816 = vmax.xlane.f32.xlu1 %v1492_v59  ;;  %v1178_v60 = vpop.f32.mrf.mxu1 }
 0x269   :  { %v740_v61 = vadd.f32 %v1178_v60, %v1032_v55  ;;  %v1497_v62 = vsel %vm793_vm1, %v729_v39, -1e+30 }
 0x26a   :  { %v731_v63 = vpop.f32.mrf.mxu1  ;;  %812 = vmax.xlane.f32.xlu0 %v1497_v62 }
 0x26b   :  { %v732_v0 = vadd.f32 %v1032_v55, %v731_v63  ;;  %v799_v1 = vsel %vm793_vm1, %v740_v61, -1e+30 }
 0x26c   :  { %818 = vmax.xlane.f32.xlu1 %v799_v1  ;;  %v1181_v2 = vpop.f32.mrf.mxu1 }
 0x26d   :  { %v753_v3 = vadd.f32 %v1181_v2, %v1032_v55  ;;  %v797_v4 = vsel %vm793_vm1, %v732_v0, -1e+30 }
 0x26e   :  { %v744_v5 = vpop.f32.mrf.mxu1  ;;  %814 = vmax.xlane.f32.xlu0 %v797_v4 }
 0x26f   :  { %v745_v7 = vadd.f32 %v1032_v55, %v744_v5  ;;  %v802_v9 = vsel %vm793_vm1, %v753_v3, -1e+30 }
 0x270   :  { %v1182_v6 = vpop.f32.mrf.mxu1 }
 0x271   :  { %v756_v8 = vadd.f32 %v1182_v6, %v1032_v55  ;;  %v800_v15 = vsel %vm793_vm1, %v745_v7, -1e+30 }
 0x272   :  { %v747_v10 = vpop.f32.mrf.mxu1  ;;  %824 = vmax.xlane.f32.xlu0 %v802_v9 }
 0x273   :  { %v748_v11 = vadd.f32 %v1032_v55, %v747_v10  ;;  %v803_v12 = vsel %vm793_vm1, %v756_v8, -1e+30 }
 0x274   :  { %826 = vmax.xlane.f32.xlu1 %v803_v12  ;;  %v1185_v13 = vpop.f32.mrf.mxu1 }
 0x275   :  { %v769_v14 = vadd.f32 %v1185_v13, %v1032_v55  ;;  %v1512_v17 = vsel %vm793_vm1, %v748_v11, -1e+30 }
 0x276   :  { %v760_v16 = vpop.f32.mrf.mxu1  ;;  %820 = vmax.xlane.f32.xlu0 %v800_v15 }
 0x277   :  { %v761_v19 = vadd.f32 %v1032_v55, %v760_v16  ;;  %v1517_v21 = vsel %vm793_vm1, %v769_v14, -1e+30 }
 0x278   :  { %v1186_v18 = vpop.f32.mrf.mxu1  ;;  %822 = vmax.xlane.f32.xlu1 %v1512_v17 }
 0x279   :  { %v772_v20 = vadd.f32 %v1186_v18, %v1032_v55  ;;  %v1527_v26 = vsel %vm793_vm1, %v761_v19, -1e+30 }
 0x27a   :  { %v763_v22 = vpop.f32.mrf.mxu1  ;;  %832 = vmax.xlane.f32.xlu0 %v1517_v21 }
 0x27b   :  { %v764_v23 = vadd.f32 %v1032_v55, %v763_v22  ;;  %v1522_v24 = vsel %vm793_vm1, %v772_v20, -1e+30 }
 0x27c   :  { %834 = vmax.xlane.f32.xlu1 %v1522_v24 }
 0x27d   :  { %v1189_v25 = vpop.f32.mrf.mxu1  ;;  %v1532_v29 = vsel %vm793_vm1, %v764_v23, -1e+30 }
 0x27e   :  { %828 = vmax.xlane.f32.xlu0 %v1527_v26  ;;  %v785_v31 = vadd.f32 %v1189_v25, %v1032_v55 }
 0x27f   :  { %v776_v27 = vpop.f32.mrf.mxu1 }
 0x280   :  { %v777_v28 = vadd.f32 %v1032_v55, %v776_v27  ;;  %830 = vmax.xlane.f32.xlu1 %v1532_v29  ;;  %v1546_v37 = vsel %vm793_vm1, %v785_v31, -1e+30 }
 0x281   :  { %v1190_v30 = vpop.f32.mrf.mxu1 }
 0x282   :  { %v1537_v32 = vsel %vm793_vm1, %v777_v28, -1e+30  ;;  %v788_v35 = vadd.f32 %v1190_v30, %v1032_v55 }
 0x283   :  { %v779_v33 = vpop.f32.mrf.mxu1  ;;  %836 = vmax.xlane.f32.xlu0 %v1537_v32 }
 0x284   :  { %v780_v34 = vadd.f32 %v1032_v55, %v779_v33  ;;  %v1552_v38 = vsel %vm793_vm1, %v788_v35, -1e+30 }
 0x286   :  { %v1542_v36 = vsel %vm793_vm1, %v780_v34, -1e+30 }
 0x287   :  { %838 = vmax.xlane.f32.xlu1 %v1542_v36  ;;  %840 = vmax.xlane.f32.xlu0 %v1546_v37 }
 0x28b   :  { %842 = vmax.xlane.f32.xlu1 %v1552_v38 }
 0x2f1   :  { %v817_v40 = vpop.xlane.xlu1 %816 }
 0x2f2   :  { %v846_v41 = vsub.f32 %v1492_v59, %v817_v40 }
 0x2f3   :  { %v813_v42 = vpop.xlane.xlu0 %812 }
 0x2f4   :  { %v864_v43 = vmul.f32 1.442695, %v846_v41  ;;  %v844_v44 = vsub.f32 %v1497_v62, %v813_v42 }
 0x2f5   :  { %v819_v45 = vpop.xlane.xlu1 %818 }
 0x2f6   :  { %1228 = vpow2.f32 %v864_v43  ;;  %v860_v46 = vmul.f32 1.442695, %v844_v44  ;;  %v847_v47 = vsub.f32 %v799_v1, %v819_v45 }
 0x2f7   :  { %v815_v48 = vpop.xlane.xlu0 %814 }
 0x2f8   :  { %v866_v49 = vmul.f32 1.442695, %v847_v47  ;;  %v845_v50 = vsub.f32 %v797_v4, %v815_v48  ;;  %1230 = vpow2.f32 %v860_v46 }
 0x2fa   :  { %1232 = vpow2.f32 %v866_v49  ;;  %v862_v51 = vmul.f32 1.442695, %v845_v50 }
 0x2fb   :  { %v825_v52 = vpop.xlane.xlu0 %824 }
 0x2fc   :  { %v850_v53 = vsub.f32 %v802_v9, %v825_v52  ;;  %1234 = vpow2.f32 %v862_v51 }
 0x2fd   :  { %v827_v54 = vpop.xlane.xlu1 %826 }
 0x2fe   :  { %v872_v55 = vmul.f32 1.442695, %v850_v53  ;;  %v851_v56 = vsub.f32 %v803_v12, %v827_v54 }
 0x2ff   :  { %v821_v57 = vpop.xlane.xlu0 %820 }
 0x300   :  { %1236 = vpow2.f32 %v872_v55  ;;  %v874_v58 = vmul.f32 1.442695, %v851_v56  ;;  %v848_v39 = vsub.f32 %v800_v15, %v821_v57 }
 0x301   :  { %v823_v59 = vpop.xlane.xlu1 %822 }
 0x302   :  { %1238 = vpow2.f32 %v874_v58  ;;  %v868_v60 = vmul.f32 1.442695, %v848_v39  ;;  %v849_v61 = vsub.f32 %v1512_v17, %v823_v59 }
 0x303   :  { %v1558_v62 = vpop.eup %1228  ;;  %v833_v63 = vpop.xlane.xlu0 %832 }
 0x304   :  { %1240 = vpow2.f32 %v868_v60  ;;  %v870_v0 = vmul.f32 1.442695, %v849_v61  ;;  %v854_v1 = vsub.f32 %v1517_v21, %v833_v63  ;;  %896 = vadd.xlane.f32.xlu0 %v1558_v62 }
 0x305   :  { %v835_v2 = vpop.xlane.xlu1 %834  ;;  %v1562_v3 = vpop.eup %1230 }
 0x306   :  { %1242 = vpow2.f32 %v870_v0  ;;  %v880_v4 = vmul.f32 1.442695, %v854_v1  ;;  %v855_v5 = vsub.f32 %v1522_v24, %v835_v2 }
 0x307   :  { %v1565_v6 = vpop.eup %1232  ;;  %v829_v7 = vpop.xlane.xlu0 %828 }
 0x308   :  { %1244 = vpow2.f32 %v880_v4  ;;  %v882_v8 = vmul.f32 1.442695, %v855_v5  ;;  %v852_v9 = vsub.f32 %v1527_v26, %v829_v7  ;;  %898 = vadd.xlane.f32.xlu1 %v1565_v6  ;;  %892 = vadd.xlane.f32.xlu0 %v1562_v3 }
 0x309   :  { %v831_v10 = vpop.xlane.xlu1 %830  ;;  %v1571_v13 = vpop.eup %1234 }
 0x30a   :  { %1246 = vpow2.f32 %v882_v8  ;;  %v876_v11 = vmul.f32 1.442695, %v852_v9  ;;  %v853_v12 = vsub.f32 %v1532_v29, %v831_v10 }
 0x30c   :  { %v837_v14 = vpop.xlane.xlu0 %836  ;;  %1248 = vpow2.f32 %v876_v11  ;;  %v878_v15 = vmul.f32 1.442695, %v853_v12  ;;  %894 = vadd.xlane.f32.xlu1 %v1571_v13 }
 0x30d   :  { %v856_v16 = vsub.f32 %v1537_v32, %v837_v14  ;;  %v1575_v17 = vpop.eup %1236 }
 0x30e   :  { %1250 = vpow2.f32 %v878_v15  ;;  %904 = vadd.xlane.f32.xlu0 %v1575_v17 }
 0x30f   :  { %v884_v18 = vmul.f32 1.442695, %v856_v16  ;;  %v1578_v19 = vpop.eup %1238 }
 0x310   :  { %v839_v20 = vpop.xlane.xlu1 %838  ;;  %v841_v21 = vpop.xlane.xlu0 %840  ;;  %906 = vadd.xlane.f32.xlu1 %v1578_v19 }
 0x311   :  { %1252 = vpow2.f32 %v884_v18  ;;  %v857_v22 = vsub.f32 %v1542_v36, %v839_v20  ;;  %v858_v23 = vsub.f32 %v1546_v37, %v841_v21  ;;  %v1583_v24 = vpop.eup %1240 }
 0x312   :  { %900 = vadd.xlane.f32.xlu0 %v1583_v24 }
 0x313   :  { %v886_v25 = vmul.f32 1.442695, %v857_v22  ;;  %v888_v26 = vmul.f32 1.442695, %v858_v23  ;;  %v1586_v27 = vpop.eup %1242 }
 0x314   :  { %v843_v28 = vpop.xlane.xlu1 %842  ;;  %902 = vadd.xlane.f32.xlu1 %v1586_v27 }
 0x315   :  { %1254 = vpow2.f32 %v886_v25  ;;  %v859_v29 = vsub.f32 %v1552_v38, %v843_v28  ;;  %v1590_v30 = vpop.eup %1244 }
 0x316   :  { %1256 = vpow2.f32 %v888_v26  ;;  %912 = vadd.xlane.f32.xlu0 %v1590_v30 }
 0x317   :  { %v890_v31 = vmul.f32 1.442695, %v859_v29  ;;  %v1593_v32 = vpop.eup %1246 }
 0x318   :  { %914 = vadd.xlane.f32.xlu1 %v1593_v32 }
 0x319   :  { %1258 = vpow2.f32 %v890_v31  ;;  %v1596_v33 = vpop.eup %1248 }
 0x31a   :  { %908 = vadd.xlane.f32.xlu0 %v1596_v33 }
 0x31b   :  { %v1599_v34 = vpop.eup %1250 }
 0x31c   :  { %910 = vadd.xlane.f32.xlu1 %v1599_v34 }
 0x31e   :  { %v1602_v35 = vpop.eup %1252 }
 0x31f   :  { %916 = vadd.xlane.f32.xlu0 %v1602_v35 }
 0x322   :  { %v1605_v36 = vpop.eup %1254 }
 0x323   :  { %v1607_v37 = vpop.eup %1256  ;;  %918 = vadd.xlane.f32.xlu1 %v1605_v36 }
 0x324   :  { %920 = vadd.xlane.f32.xlu0 %v1607_v37 }
 0x326   :  { %v1611_v38 = vpop.eup %1258 }
 0x327   :  { %922 = vadd.xlane.f32.xlu1 %v1611_v38 }
 0x38d   :  { %v897_v40 = vpop.xlane.xlu0 %896 }
 0x38e   :  { %1260 = vrcp.f32 %v897_v40 }
 0x391   :  { %v899_v41 = vpop.xlane.xlu1 %898  ;;  %v893_v42 = vpop.xlane.xlu0 %892 }
 0x392   :  { %1262 = vrcp.f32 %v899_v41 }
 0x393   :  { %1264 = vrcp.f32 %v893_v42 }
 0x395   :  { %v895_v43 = vpop.xlane.xlu1 %894 }
 0x396   :  { %1266 = vrcp.f32 %v895_v43 }
 0x397   :  { %v905_v44 = vpop.xlane.xlu0 %904 }
 0x398   :  { %1268 = vrcp.f32 %v905_v44 }
 0x399   :  { %v907_v45 = vpop.xlane.xlu1 %906 }
 0x39a   :  { %1270 = vrcp.f32 %v907_v45 }
 0x39b   :  { %v1261_v46 = vpop.eup %1260  ;;  %v901_v47 = vpop.xlane.xlu0 %900 }
 0x39c   :  { %v929_v48 = vmul.f32 %v1261_v46, %v1558_v62  ;;  %1272 = vrcp.f32 %v901_v47 }
 0x39d   :  { %v903_v49 = vpop.xlane.xlu1 %902 }
 0x39e   :  { %958 = vst [vmem:[#allocation2 + $0x10] sm:$0xff] %v929_v48  ;;  %1274 = vrcp.f32 %v903_v49 }
 0x39f   :  { %v1263_v50 = vpop.eup %1262  ;;  %v913_v51 = vpop.xlane.xlu0 %912 }
 0x3a0   :  { %v1265_v52 = vpop.eup %1264  ;;  %v931_v53 = vmul.f32 %v1263_v50, %v1565_v6  ;;  %1276 = vrcp.f32 %v913_v51 }
 0x3a1   :  { %v925_v54 = vmul.f32 %v1265_v52, %v1562_v3  ;;  %v915_v55 = vpop.xlane.xlu1 %914 }
 0x3a2   :  { %959 = vst [vmem:[#allocation2 + $0x18] sm:$0xff] %v931_v53  ;;  %1278 = vrcp.f32 %v915_v55 }
 0x3a3   :  { %v1267_v56 = vpop.eup %1266  ;;  %956 = vst [vmem:[#allocation2] sm:$0xff] %v925_v54  ;;  %v909_v57 = vpop.xlane.xlu0 %908 }
 0x3a4   :  { %v927_v58 = vmul.f32 %v1267_v56, %v1571_v13  ;;  %1280 = vrcp.f32 %v909_v57 }
 0x3a5   :  { %v1269_v39 = vpop.eup %1268  ;;  %v911_v59 = vpop.xlane.xlu1 %910 }
 0x3a6   :  { %957 = vst [vmem:[#allocation2 + $0x8] sm:$0xff] %v927_v58  ;;  %v937_v60 = vmul.f32 %v1269_v39, %v1575_v17  ;;  %1282 = vrcp.f32 %v911_v59 }
 0x3a7   :  { %v1271_v61 = vpop.eup %1270 }
 0x3a8   :  { %v917_v62 = vpop.xlane.xlu0 %916  ;;  %962 = vst [vmem:[#allocation2 + $0x30] sm:$0xff] %v937_v60  ;;  %v939_v63 = vmul.f32 %v1271_v61, %v1578_v19 }
 0x3a9   :  { %1284 = vrcp.f32 %v917_v62  ;;  %v1273_v0 = vpop.eup %1272 }
 0x3aa   :  { %963 = vst [vmem:[#allocation2 + $0x38] sm:$0xff] %v939_v63  ;;  %v933_v1 = vmul.f32 %v1273_v0, %v1583_v24 }
 0x3ab   :  { %v1275_v2 = vpop.eup %1274 }
 0x3ac   :  { %v919_v3 = vpop.xlane.xlu1 %918  ;;  %960 = vst [vmem:[#allocation2 + $0x20] sm:$0xff] %v933_v1  ;;  %v935_v4 = vmul.f32 %v1275_v2, %v1586_v27 }
 0x3ad   :  { %1286 = vrcp.f32 %v919_v3  ;;  %v921_v5 = vpop.xlane.xlu0 %920  ;;  %v1277_v6 = vpop.eup %1276 }
 0x3ae   :  { %1288 = vrcp.f32 %v921_v5  ;;  %961 = vst [vmem:[#allocation2 + $0x28] sm:$0xff] %v935_v4  ;;  %v945_v7 = vmul.f32 %v1277_v6, %v1590_v30 }
 0x3af   :  { %v1279_v8 = vpop.eup %1278 }
 0x3b0   :  { %v923_v9 = vpop.xlane.xlu1 %922  ;;  %966 = vst [vmem:[#allocation2 + $0x50] sm:$0xff] %v945_v7  ;;  %v947_v10 = vmul.f32 %v1279_v8, %v1593_v32 }
 0x3b1   :  { %1290 = vrcp.f32 %v923_v9  ;;  %v1281_v11 = vpop.eup %1280 }
 0x3b2   :  { %967 = vst [vmem:[#allocation2 + $0x58] sm:$0xff] %v947_v10  ;;  %v941_v12 = vmul.f32 %v1281_v11, %v1596_v33 }
 0x3b3   :  { %v1283_v13 = vpop.eup %1282 }
 0x3b4   :  { %964 = vst [vmem:[#allocation2 + $0x40] sm:$0xff] %v941_v12  ;;  %v943_v14 = vmul.f32 %v1283_v13, %v1599_v34 }
 0x3b6   :  { %v1285_v15 = vpop.eup %1284  ;;  %965 = vst [vmem:[#allocation2 + $0x48] sm:$0xff] %v943_v14 }
 0x3b7   :  { %v949_v16 = vmul.f32 %v1285_v15, %v1602_v35 }
 0x3b9   :  { %968 = vst [vmem:[#allocation2 + $0x60] sm:$0xff] %v949_v16 }
 0x3ba   :  { %v1287_v17 = vpop.eup %1286 }
 0x3bb   :  { %v1289_v18 = vpop.eup %1288  ;;  %v951_v19 = vmul.f32 %v1287_v17, %v1605_v36 }
 0x3bc   :  { %v953_v20 = vmul.f32 %v1289_v18, %v1607_v37 }
 0x3bd   :  { %969 = vst [vmem:[#allocation2 + $0x68] sm:$0xff] %v951_v19 }
 0x3be   :  { %v1291_v21 = vpop.eup %1290  ;;  %970 = vst [vmem:[#allocation2 + $0x70] sm:$0xff] %v953_v20 }
 0x3bf   :  { %v955_v22 = vmul.f32 %v1291_v21, %v1611_v38 }
 0x3c1   :  { %971 = vst [vmem:[#allocation2 + $0x78] sm:$0xff] %v955_v22 }
 0x3c2   :  { %1303 = shalt.err (!%p1300_p4)
}
 0x3c3   :  { %s1315_s9 = smov 128   ;;  %s1316_s0 = smov 8  }
 0x3c4   :  { %983 = dma.vmem_to_hbm [thread:$0]  %s978_s8, 2048, %s1637_s4, [#allocation3], %s1315_s9, %s1315_s9, %s1316_s0  }
 0x3c5   :  { %1312 = dma.done.wait [#allocation3], 2048  }
 0x3c6   :  { %1313 = vsyncadd [#allocation3], 4294965248 }
 0x3c7   :  { %987 = vsyncpa [#allocation3], 1 }

</bundles_post_ra>
